<compile_context>
chip_gen: v5e
topology: v5e:2x2
jax: 0.10.0
libtpu: 0.0.40
codegen_flags: <defaults>
</compile_context>

<pallas_src>
import functools

import jax
import jax.numpy as jnp
from jax import lax
from jax.experimental import pallas as pl
from jax.experimental.pallas import tpu as pltpu

PAD = 128  # lane-dense width every feature dimension is padded to


def _rnn_seq_kernel(n_internal, tt, x_ref, h0_ref, w_ref, b_ref,
                    out_ref, hfin_ref, h_scr):
    """Fused TT-timestep RNN cell for one batch block.

    Refs (BB = batch block, PAD = 128):
      x_ref   : (TT, BB, PAD)  padded inputs for this time block (x at lanes [0,in))
      h0_ref  : (BB, PAD)      initial hidden, already placed at lanes [in,in+hid)
      w_ref   : (n_internal+1, PAD, PAD) bf16 packed weights (resident)
      b_ref   : (n_internal+1, PAD)      f32  packed biases  (resident)
      out_ref : (TT, BB, PAD)  per-step padded output slab (out lanes [in+hid,...))
      hfin_ref: (BB, PAD)      final carried slab (hidden at lanes [in,in+hid))
      h_scr   : (BB, PAD) f32 VMEM scratch — slab carried across time blocks
    """
    t_blk = pl.program_id(1)

    @pl.when(t_blk == 0)
    def _():
        h_scr[...] = h0_ref[...]

    n_layers = n_internal + 1
    # Hoist resident weight/bias loads out of the per-timestep loop
    # (JAX does not CSE per-iteration loads/broadcasts).
    ws = [w_ref[k] for k in range(n_layers)]                # bf16 (PAD, PAD)
    bs = [b_ref[pl.ds(k, 1), :] for k in range(n_layers)]   # f32  (1, PAD)

    def dot_bf16(a, w):
        return jnp.dot(a.astype(jnp.bfloat16), w,
                       preferred_element_type=jnp.float32)

    def step(i, slab):
        # slab lanes: [0,in)=0, [in,in+hid)=h_{t-1}, [in+hid,in+hid+out)= previous
        # pre-relu output (harmless: the matching weight rows are zero), rest 0.
        # x_ref[i] has x_t at lanes [0,in) and zeros elsewhere, so one VPU add
        # rebuilds concat(x_t, h_{t-1}) with no gather/concat and no extra dot.
        a = slab + x_ref[i]
        for k in range(n_internal):                          # relu net_layers
            a = jnp.maximum(dot_bf16(a, ws[k]) + bs[k], 0.0)
        y = dot_bf16(a, ws[n_internal]) + bs[n_internal]     # fused hidden+output heads
        out_ref[i] = jnp.maximum(y, 0.0)                     # wrapper slices out lanes
        return y                                             # hidden lanes carry, no relu

    slab = lax.fori_loop(0, tt, step, h_scr[...], unroll=True)
    h_scr[...] = slab

    @pl.when(t_blk == pl.num_programs(1) - 1)
    def _():
        hfin_ref[...] = slab


def init_rnn_params(key, input_length, output_length, hidden_length,
                    internal_lengths=()):
    """PyTorch-style Linear init: U(-1/sqrt(fan_in), 1/sqrt(fan_in)).

    Returns a list of (W, b) with W as (in_features, out_features), in order:
    internal layers..., output_layer, hidden_layer.
    """
    def linear(k, fan_in, fan_out):
        kw, kb = jax.random.split(k)
        bound = 1.0 / jnp.sqrt(jnp.float32(fan_in))
        w = jax.random.uniform(kw, (fan_in, fan_out), jnp.float32, -bound, bound)
        b = jax.random.uniform(kb, (fan_out,), jnp.float32, -bound, bound)
        return w, b

    cat_len = input_length + hidden_length
    keys = jax.random.split(key, len(internal_lengths) + 2)
    params = []
    prev = cat_len
    for i, width in enumerate(internal_lengths):
        params.append(linear(keys[i], prev, width))
        prev = width
    params.append(linear(keys[-2], prev, output_length))   # output head
    params.append(linear(keys[-1], prev, hidden_length))   # hidden head
    return params


def pack_params(params, input_length, output_length, hidden_length,
                internal_lengths, pad=PAD):
    """Pack per-layer (W, b) into one (n_internal+1, pad, pad) bf16 weight slab
    and one (n_internal+1, pad) f32 bias slab.

    Layout (all padded rows/cols/lanes are zero so padding never leaks):
      * internal layer k: top-left corner of block k (W1 kept UNSPLIT: rows
        [0,in) consume x lanes, rows [in,in+hid) consume hidden lanes).
      * fused head (last block): W_hid columns at lanes [in, in+hid) and
        W_out columns at lanes [in+hid, in+hid+out), so one dot produces both
        heads AND the result doubles as the next step's carried slab.
    """
    n_internal = len(internal_lengths)
    in_len, hid_len, out_len = input_length, hidden_length, output_length
    cat_len = in_len + hid_len
    # TODO(synk): fall back to split (un-fused) heads if in+hid+out > 128 lanes.
    assert cat_len + out_len <= pad, "fused head layout needs in+hid+out <= 128"

    def place(base, w, r0, c0):
        return base.at[r0:r0 + w.shape[0], c0:c0 + w.shape[1]].set(w)

    blocks, biases = [], []
    prev = cat_len
    for k in range(n_internal):
        w, b = params[k]
        assert w.shape[0] <= pad and w.shape[1] <= pad, "feature dim exceeds PAD"
        blocks.append(place(jnp.zeros((pad, pad), jnp.float32), w, 0, 0))
        biases.append(jnp.zeros((pad,), jnp.float32).at[:b.shape[0]].set(b))
        prev = internal_lengths[k]

    (w_out, b_out) = params[n_internal]
    (w_hid, b_hid) = params[n_internal + 1]
    assert prev <= pad
    head = jnp.zeros((pad, pad), jnp.float32)
    head = place(head, w_hid, 0, in_len)
    head = place(head, w_out, 0, cat_len)
    head_b = jnp.zeros((pad,), jnp.float32)
    head_b = head_b.at[in_len:cat_len].set(b_hid)
    head_b = head_b.at[cat_len:cat_len + out_len].set(b_out)
    blocks.append(head)
    biases.append(head_b)

    return jnp.stack(blocks).astype(jnp.bfloat16), jnp.stack(biases)


def _pick_tt(T, cap=32):
    tt = min(T, cap)
    while T % tt != 0:
        tt -= 1
    return tt


def rnn_forward_sequence(x_seq, h0, params, input_length, output_length,
                         hidden_length, internal_lengths, *,
                         tt=None, bb=None, pad=PAD):
    """Run the RNN cell over a (T, B, input_length) sequence with one fused
    pallas_call. Returns (outputs (T, B, output_length), final hidden (B, hidden_length))."""
    T, B, in_chk = x_seq.shape
    assert in_chk == input_length
    assert B % 8 == 0, "pad batch to a multiple of 8 (16 preferred for bf16 packing)"
    n_internal = len(internal_lengths)

    tt = _pick_tt(T) if tt is None else tt
    assert T % tt == 0
    bb = B if bb is None else bb
    assert B % bb == 0 and bb % 8 == 0

    w_slab, b_slab = pack_params(params, input_length, output_length,
                                 hidden_length, internal_lengths, pad)
    n_blocks, n_layers = w_slab.shape[0], b_slab.shape[0]
    in_hid = input_length + hidden_length

    # Lane-dense padded layouts. TODO(synk): callers that already hold padded
    # activations can skip these pad/slice copies and pass slabs end-to-end.
    x_pad = jnp.zeros((T, B, pad), jnp.float32).at[:, :, :input_length].set(x_seq)
    h0_pad = jnp.zeros((B, pad), jnp.float32).at[:, input_length:in_hid].set(h0)

    kernel = functools.partial(_rnn_seq_kernel, n_internal, tt)

    out_pad, hfin_pad = pl.pallas_call(
        kernel,
        grid=(B // bb, T // tt),
        in_specs=[
            pl.BlockSpec((tt, bb, pad), lambda b, t: (t, b, 0)),          # x, streamed
            pl.BlockSpec((bb, pad), lambda b, t: (b, 0)),                 # h0
            pl.BlockSpec((n_blocks, pad, pad), lambda b, t: (0, 0, 0)),   # weights, resident
            pl.BlockSpec((n_layers, pad), lambda b, t: (0, 0)),           # biases, resident
        ],
        out_specs=(
            pl.BlockSpec((tt, bb, pad), lambda b, t: (t, b, 0)),          # per-step outputs
            pl.BlockSpec((bb, pad), lambda b, t: (b, 0)),                 # final slab
        ),
        out_shape=(
            jax.ShapeDtypeStruct((T, B, pad), jnp.float32),
            jax.ShapeDtypeStruct((B, pad), jnp.float32),
        ),
        scratch_shapes=[pltpu.VMEM((bb, pad), jnp.float32)],              # hidden carry
        compiler_params=pltpu.CompilerParams(
            dimension_semantics=("parallel", "arbitrary"),                # batch x time
        ),
    )(x_pad, h0_pad, w_slab, b_slab)

    out = out_pad[:, :, in_hid:in_hid + output_length]
    h_final = hfin_pad[:, input_length:in_hid]
    return out, h_final


def reference_forward_sequence(x_seq, h0, params, n_internal):
    """Pure-JAX reference: the original per-step PyTorch cell, looped over T."""
    T = x_seq.shape[0]
    h = h0
    outs = []
    for t in range(T):
        x = jnp.concatenate([x_seq[t], h], axis=-1)
        for layer in range(n_internal):
            w, b = params[layer]
            x = jnp.maximum(x @ w + b, 0.0)
        w_out, b_out = params[n_internal]
        w_hid, b_hid = params[n_internal + 1]
        outs.append(jnp.maximum(x @ w_out + b_out, 0.0))
        h = x @ w_hid + b_hid
    return jnp.stack(outs), h


if __name__ == "__main__":
    # Small shapes consistent with the module (per-agent feature vectors),
    # batched over B agents and fused over T timesteps.
    input_length = 16
    hidden_length = 32
    output_length = 8
    internal_lengths = [32]   # exercises the relu net_layers path + fused heads
    T, B = 8, 16              # B multiple of 16 -> dense bf16 sublane packing

    key = jax.random.PRNGKey(0)
    k_x, k_h, k_p = jax.random.split(key, 3)

    x_seq = jax.random.normal(k_x, (T, B, input_length), jnp.float32)
    h0 = 0.1 * jax.random.normal(k_h, (B, hidden_length), jnp.float32)

    params = init_rnn_params(
        k_p, input_length, output_length, hidden_length, internal_lengths
    )

    out_seq, h_final = rnn_forward_sequence(
        x_seq, h0, params, input_length, output_length, hidden_length,
        internal_lengths
    )
    jax.block_until_ready((out_seq, h_final))

    ref_out, ref_hid = reference_forward_sequence(
        x_seq, h0, params, len(internal_lengths)
    )

    assert out_seq.shape == (T, B, output_length)
    assert h_final.shape == (B, hidden_length)
    # Loose tolerance: weights/activations are fed to the MXU in bf16 (f32 acc);
    # the recurrence is strongly contractive with this init so the error does
    # not grow with T. Real layout/packing bugs would show up as O(1) errors.
    assert jnp.allclose(out_seq, ref_out, atol=5e-2, rtol=5e-2), "output mismatch"
    assert jnp.allclose(h_final, ref_hid, atol=5e-2, rtol=5e-2), "hidden mismatch"

    print("KERNEL_OK")
</pallas_src>

<mosaic_0001>
module attributes {stable_mosaic.version = 11 : i64} {
  func.func @_rnn_seq_kernel(%arg0: i32, %arg1: i32, %arg2: memref<8x16x128xf32, #tpu.memory_space<vmem>>, %arg3: memref<16x128xf32, #tpu.memory_space<vmem>>, %arg4: memref<2x128x128xbf16, #tpu.memory_space<vmem>>, %arg5: memref<2x128xf32, #tpu.memory_space<vmem>>, %arg6: memref<8x16x128xf32, #tpu.memory_space<vmem>>, %arg7: memref<16x128xf32, #tpu.memory_space<vmem>>, %arg8: memref<16x128xf32, #tpu.memory_space<vmem>>) attributes {dimension_semantics = [#tpu.dimension_semantics<parallel>, #tpu.dimension_semantics<arbitrary>], iteration_bounds = array<i64: 1, 1>, scalar_prefetch = 0 : i64, scratch_operands = 1 : i64, tpu.core_type = #tpu.core_type<tc>, window_params = [{transform_indices = @transform_0, window_bounds = array<i64: 8, 16, 128>}, {transform_indices = @transform_1, window_bounds = array<i64: 16, 128>}, {pipeline_mode = #tpu.pipeline_mode<synchronous>, transform_indices = @transform_2, window_bounds = array<i64: 2, 128, 128>}, {pipeline_mode = #tpu.pipeline_mode<synchronous>, transform_indices = @transform_3, window_bounds = array<i64: 2, 128>}, {transform_indices = @transform_4, window_bounds = array<i64: 8, 16, 128>}, {transform_indices = @transform_5, window_bounds = array<i64: 16, 128>}]} {
    %c0_i32 = arith.constant 0 : i32
    %0 = arith.cmpi eq, %arg1, %c0_i32 : i32
    %1 = arith.extui %0 : i1 to i32
    %c0_i32_0 = arith.constant 0 : i32
    %2 = arith.cmpi ne, %1, %c0_i32_0 : i32
    scf.if %2 {
      %c0_79 = arith.constant 0 : index
      %c0_80 = arith.constant 0 : index
      %174 = vector.load %arg3[%c0_79, %c0_80] : memref<16x128xf32, #tpu.memory_space<vmem>>, vector<16x128xf32>
      %c0_81 = arith.constant 0 : index
      %c0_82 = arith.constant 0 : index
      %175 = vector.load %arg8[%c0_81, %c0_82] : memref<16x128xf32, #tpu.memory_space<vmem>>, vector<16x128xf32>
      tpu.vector_store %arg8[%c0_81, %c0_82], %174 {strides = array<i32>} : memref<16x128xf32, #tpu.memory_space<vmem>>, vector<16x128xf32>,
    } else {
    }
    %c0 = arith.constant 0 : index
    %c0_1 = arith.constant 0 : index
    %c0_2 = arith.constant 0 : index
    %3 = vector.load %arg4[%c0, %c0_1, %c0_2] : memref<2x128x128xbf16, #tpu.memory_space<vmem>>, vector<1x128x128xbf16>
    %4 = vector.shape_cast %3 : vector<1x128x128xbf16> to vector<128x128xbf16>
    %c1 = arith.constant 1 : index
    %c0_3 = arith.constant 0 : index
    %c0_4 = arith.constant 0 : index
    %5 = vector.load %arg4[%c1, %c0_3, %c0_4] : memref<2x128x128xbf16, #tpu.memory_space<vmem>>, vector<1x128x128xbf16>
    %6 = vector.shape_cast %5 : vector<1x128x128xbf16> to vector<128x128xbf16>
    %c0_5 = arith.constant 0 : index
    %c0_6 = arith.constant 0 : index
    %7 = vector.load %arg5[%c0_5, %c0_6] : memref<2x128xf32, #tpu.memory_space<vmem>>, vector<1x128xf32>
    %c1_7 = arith.constant 1 : index
    %c0_8 = arith.constant 0 : index
    %8 = vector.load %arg5[%c1_7, %c0_8] : memref<2x128xf32, #tpu.memory_space<vmem>>, vector<1x128xf32>
    %c0_9 = arith.constant 0 : index
    %c0_10 = arith.constant 0 : index
    %9 = vector.load %arg8[%c0_9, %c0_10] : memref<16x128xf32, #tpu.memory_space<vmem>>, vector<16x128xf32>
    %c0_i32_11 = arith.constant 0 : i32
    %10 = arith.index_cast %c0_i32_11 : i32 to index
    %c0_12 = arith.constant 0 : index
    %c0_13 = arith.constant 0 : index
    %11 = vector.load %arg2[%10, %c0_12, %c0_13] : memref<8x16x128xf32, #tpu.memory_space<vmem>>, vector<1x16x128xf32>
    %12 = vector.shape_cast %11 : vector<1x16x128xf32> to vector<16x128xf32>
    %13 = arith.addf %9, %12 : vector<16x128xf32>
    %14 = arith.truncf %13 : vector<16x128xf32> to vector<16x128xbf16>
    %cst = arith.constant dense<0.000000e+00> : vector<16x128xf32>
    %15 = tpu.matmul %14, %4, %cst {dimension_numbers = #tpu.dot_dimension_numbers<[1], [0], [0], [1], [0, 0, 1, 1], [], []>} : vector<16x128xbf16>, vector<128x128xbf16>, vector<16x128xf32> -> vector<16x128xf32>
    %16 = vector.broadcast %7 : vector<1x128xf32> to vector<16x128xf32>
    %17 = arith.addf %15, %16 : vector<16x128xf32>
    %cst_14 = arith.constant 0.000000e+00 : f32
    %18 = vector.broadcast %cst_14 : f32 to vector<16x128xf32>
    %19 = arith.maximumf %17, %18 : vector<16x128xf32>
    %20 = arith.truncf %19 : vector<16x128xf32> to vector<16x128xbf16>
    %cst_15 = arith.constant dense<0.000000e+00> : vector<16x128xf32>
    %21 = tpu.matmul %20, %6, %cst_15 {dimension_numbers = #tpu.dot_dimension_numbers<[1], [0], [0], [1], [0, 0, 1, 1], [], []>} : vector<16x128xbf16>, vector<128x128xbf16>, vector<16x128xf32> -> vector<16x128xf32>
    %22 = vector.broadcast %8 : vector<1x128xf32> to vector<16x128xf32>
    %23 = arith.addf %21, %22 : vector<16x128xf32>
    %cst_16 = arith.constant 0.000000e+00 : f32
    %24 = vector.broadcast %cst_16 : f32 to vector<16x128xf32>
    %25 = arith.maximumf %23, %24 : vector<16x128xf32>
    %26 = arith.index_cast %c0_i32_11 : i32 to index
    %c0_17 = arith.constant 0 : index
    %c0_18 = arith.constant 0 : index
    %27 = vector.load %arg6[%26, %c0_17, %c0_18] : memref<8x16x128xf32, #tpu.memory_space<vmem>>, vector<1x16x128xf32>
    %28 = vector.shape_cast %27 : vector<1x16x128xf32> to vector<16x128xf32>
    %29 = vector.shape_cast %25 : vector<16x128xf32> to vector<1x16x128xf32>
    tpu.vector_store %arg6[%26, %c0_17, %c0_18], %29 {strides = array<i32>} : memref<8x16x128xf32, #tpu.memory_space<vmem>>, vector<1x16x128xf32>,
    %c1_i32 = arith.constant 1 : i32
    %30 = arith.index_cast %c1_i32 : i32 to index
    %c0_19 = arith.constant 0 : index
    %c0_20 = arith.constant 0 : index
    %31 = vector.load %arg2[%30, %c0_19, %c0_20] : memref<8x16x128xf32, #tpu.memory_space<vmem>>, vector<1x16x128xf32>
    %32 = vector.shape_cast %31 : vector<1x16x128xf32> to vector<16x128xf32>
    %33 = arith.addf %23, %32 : vector<16x128xf32>
    %34 = arith.truncf %33 : vector<16x128xf32> to vector<16x128xbf16>
    %cst_21 = arith.constant dense<0.000000e+00> : vector<16x128xf32>
    %35 = tpu.matmul %34, %4, %cst_21 {dimension_numbers = #tpu.dot_dimension_numbers<[1], [0], [0], [1], [0, 0, 1, 1], [], []>} : vector<16x128xbf16>, vector<128x128xbf16>, vector<16x128xf32> -> vector<16x128xf32>
    %36 = vector.broadcast %7 : vector<1x128xf32> to vector<16x128xf32>
    %37 = arith.addf %35, %36 : vector<16x128xf32>
    %cst_22 = arith.constant 0.000000e+00 : f32
    %38 = vector.broadcast %cst_22 : f32 to vector<16x128xf32>
    %39 = arith.maximumf %37, %38 : vector<16x128xf32>
    %40 = arith.truncf %39 : vector<16x128xf32> to vector<16x128xbf16>
    %cst_23 = arith.constant dense<0.000000e+00> : vector<16x128xf32>
    %41 = tpu.matmul %40, %6, %cst_23 {dimension_numbers = #tpu.dot_dimension_numbers<[1], [0], [0], [1], [0, 0, 1, 1], [], []>} : vector<16x128xbf16>, vector<128x128xbf16>, vector<16x128xf32> -> vector<16x128xf32>
    %42 = vector.broadcast %8 : vector<1x128xf32> to vector<16x128xf32>
    %43 = arith.addf %41, %42 : vector<16x128xf32>
    %cst_24 = arith.constant 0.000000e+00 : f32
    %44 = vector.broadcast %cst_24 : f32 to vector<16x128xf32>
    %45 = arith.maximumf %43, %44 : vector<16x128xf32>
    %46 = arith.index_cast %c1_i32 : i32 to index
    %c0_25 = arith.constant 0 : index
    %c0_26 = arith.constant 0 : index
    %47 = vector.load %arg6[%46, %c0_25, %c0_26] : memref<8x16x128xf32, #tpu.memory_space<vmem>>, vector<1x16x128xf32>
    %48 = vector.shape_cast %47 : vector<1x16x128xf32> to vector<16x128xf32>
    %49 = vector.shape_cast %45 : vector<16x128xf32> to vector<1x16x128xf32>
    tpu.vector_store %arg6[%46, %c0_25, %c0_26], %49 {strides = array<i32>} : memref<8x16x128xf32, #tpu.memory_space<vmem>>, vector<1x16x128xf32>,
    %c2_i32 = arith.constant 2 : i32
    %50 = arith.index_cast %c2_i32 : i32 to index
    %c0_27 = arith.constant 0 : index
    %c0_28 = arith.constant 0 : index
    %51 = vector.load %arg2[%50, %c0_27, %c0_28] : memref<8x16x128xf32, #tpu.memory_space<vmem>>, vector<1x16x128xf32>
    %52 = vector.shape_cast %51 : vector<1x16x128xf32> to vector<16x128xf32>
    %53 = arith.addf %43, %52 : vector<16x128xf32>
    %54 = arith.truncf %53 : vector<16x128xf32> to vector<16x128xbf16>
    %cst_29 = arith.constant dense<0.000000e+00> : vector<16x128xf32>
    %55 = tpu.matmul %54, %4, %cst_29 {dimension_numbers = #tpu.dot_dimension_numbers<[1], [0], [0], [1], [0, 0, 1, 1], [], []>} : vector<16x128xbf16>, vector<128x128xbf16>, vector<16x128xf32> -> vector<16x128xf32>
    %56 = vector.broadcast %7 : vector<1x128xf32> to vector<16x128xf32>
    %57 = arith.addf %55, %56 : vector<16x128xf32>
    %cst_30 = arith.constant 0.000000e+00 : f32
    %58 = vector.broadcast %cst_30 : f32 to vector<16x128xf32>
    %59 = arith.maximumf %57, %58 : vector<16x128xf32>
    %60 = arith.truncf %59 : vector<16x128xf32> to vector<16x128xbf16>
    %cst_31 = arith.constant dense<0.000000e+00> : vector<16x128xf32>
    %61 = tpu.matmul %60, %6, %cst_31 {dimension_numbers = #tpu.dot_dimension_numbers<[1], [0], [0], [1], [0, 0, 1, 1], [], []>} : vector<16x128xbf16>, vector<128x128xbf16>, vector<16x128xf32> -> vector<16x128xf32>
    %62 = vector.broadcast %8 : vector<1x128xf32> to vector<16x128xf32>
    %63 = arith.addf %61, %62 : vector<16x128xf32>
    %cst_32 = arith.constant 0.000000e+00 : f32
    %64 = vector.broadcast %cst_32 : f32 to vector<16x128xf32>
    %65 = arith.maximumf %63, %64 : vector<16x128xf32>
    %66 = arith.index_cast %c2_i32 : i32 to index
    %c0_33 = arith.constant 0 : index
    %c0_34 = arith.constant 0 : index
    %67 = vector.load %arg6[%66, %c0_33, %c0_34] : memref<8x16x128xf32, #tpu.memory_space<vmem>>, vector<1x16x128xf32>
    %68 = vector.shape_cast %67 : vector<1x16x128xf32> to vector<16x128xf32>
    %69 = vector.shape_cast %65 : vector<16x128xf32> to vector<1x16x128xf32>
    tpu.vector_store %arg6[%66, %c0_33, %c0_34], %69 {strides = array<i32>} : memref<8x16x128xf32, #tpu.memory_space<vmem>>, vector<1x16x128xf32>,
    %c3_i32 = arith.constant 3 : i32
    %70 = arith.index_cast %c3_i32 : i32 to index
    %c0_35 = arith.constant 0 : index
    %c0_36 = arith.constant 0 : index
    %71 = vector.load %arg2[%70, %c0_35, %c0_36] : memref<8x16x128xf32, #tpu.memory_space<vmem>>, vector<1x16x128xf32>
    %72 = vector.shape_cast %71 : vector<1x16x128xf32> to vector<16x128xf32>
    %73 = arith.addf %63, %72 : vector<16x128xf32>
    %74 = arith.truncf %73 : vector<16x128xf32> to vector<16x128xbf16>
    %cst_37 = arith.constant dense<0.000000e+00> : vector<16x128xf32>
    %75 = tpu.matmul %74, %4, %cst_37 {dimension_numbers = #tpu.dot_dimension_numbers<[1], [0], [0], [1], [0, 0, 1, 1], [], []>} : vector<16x128xbf16>, vector<128x128xbf16>, vector<16x128xf32> -> vector<16x128xf32>
    %76 = vector.broadcast %7 : vector<1x128xf32> to vector<16x128xf32>
    %77 = arith.addf %75, %76 : vector<16x128xf32>
    %cst_38 = arith.constant 0.000000e+00 : f32
    %78 = vector.broadcast %cst_38 : f32 to vector<16x128xf32>
    %79 = arith.maximumf %77, %78 : vector<16x128xf32>
    %80 = arith.truncf %79 : vector<16x128xf32> to vector<16x128xbf16>
    %cst_39 = arith.constant dense<0.000000e+00> : vector<16x128xf32>
    %81 = tpu.matmul %80, %6, %cst_39 {dimension_numbers = #tpu.dot_dimension_numbers<[1], [0], [0], [1], [0, 0, 1, 1], [], []>} : vector<16x128xbf16>, vector<128x128xbf16>, vector<16x128xf32> -> vector<16x128xf32>
    %82 = vector.broadcast %8 : vector<1x128xf32> to vector<16x128xf32>
    %83 = arith.addf %81, %82 : vector<16x128xf32>
    %cst_40 = arith.constant 0.000000e+00 : f32
    %84 = vector.broadcast %cst_40 : f32 to vector<16x128xf32>
    %85 = arith.maximumf %83, %84 : vector<16x128xf32>
    %86 = arith.index_cast %c3_i32 : i32 to index
    %c0_41 = arith.constant 0 : index
    %c0_42 = arith.constant 0 : index
    %87 = vector.load %arg6[%86, %c0_41, %c0_42] : memref<8x16x128xf32, #tpu.memory_space<vmem>>, vector<1x16x128xf32>
    %88 = vector.shape_cast %87 : vector<1x16x128xf32> to vector<16x128xf32>
    %89 = vector.shape_cast %85 : vector<16x128xf32> to vector<1x16x128xf32>
    tpu.vector_store %arg6[%86, %c0_41, %c0_42], %89 {strides = array<i32>} : memref<8x16x128xf32, #tpu.memory_space<vmem>>, vector<1x16x128xf32>,
    %c4_i32 = arith.constant 4 : i32
    %90 = arith.index_cast %c4_i32 : i32 to index
    %c0_43 = arith.constant 0 : index
    %c0_44 = arith.constant 0 : index
    %91 = vector.load %arg2[%90, %c0_43, %c0_44] : memref<8x16x128xf32, #tpu.memory_space<vmem>>, vector<1x16x128xf32>
    %92 = vector.shape_cast %91 : vector<1x16x128xf32> to vector<16x128xf32>
    %93 = arith.addf %83, %92 : vector<16x128xf32>
    %94 = arith.truncf %93 : vector<16x128xf32> to vector<16x128xbf16>
    %cst_45 = arith.constant dense<0.000000e+00> : vector<16x128xf32>
    %95 = tpu.matmul %94, %4, %cst_45 {dimension_numbers = #tpu.dot_dimension_numbers<[1], [0], [0], [1], [0, 0, 1, 1], [], []>} : vector<16x128xbf16>, vector<128x128xbf16>, vector<16x128xf32> -> vector<16x128xf32>
    %96 = vector.broadcast %7 : vector<1x128xf32> to vector<16x128xf32>
    %97 = arith.addf %95, %96 : vector<16x128xf32>
    %cst_46 = arith.constant 0.000000e+00 : f32
    %98 = vector.broadcast %cst_46 : f32 to vector<16x128xf32>
    %99 = arith.maximumf %97, %98 : vector<16x128xf32>
    %100 = arith.truncf %99 : vector<16x128xf32> to vector<16x128xbf16>
    %cst_47 = arith.constant dense<0.000000e+00> : vector<16x128xf32>
    %101 = tpu.matmul %100, %6, %cst_47 {dimension_numbers = #tpu.dot_dimension_numbers<[1], [0], [0], [1], [0, 0, 1, 1], [], []>} : vector<16x128xbf16>, vector<128x128xbf16>, vector<16x128xf32> -> vector<16x128xf32>
    %102 = vector.broadcast %8 : vector<1x128xf32> to vector<16x128xf32>
    %103 = arith.addf %101, %102 : vector<16x128xf32>
    %cst_48 = arith.constant 0.000000e+00 : f32
    %104 = vector.broadcast %cst_48 : f32 to vector<16x128xf32>
    %105 = arith.maximumf %103, %104 : vector<16x128xf32>
    %106 = arith.index_cast %c4_i32 : i32 to index
    %c0_49 = arith.constant 0 : index
    %c0_50 = arith.constant 0 : index
    %107 = vector.load %arg6[%106, %c0_49, %c0_50] : memref<8x16x128xf32, #tpu.memory_space<vmem>>, vector<1x16x128xf32>
    %108 = vector.shape_cast %107 : vector<1x16x128xf32> to vector<16x128xf32>
    %109 = vector.shape_cast %105 : vector<16x128xf32> to vector<1x16x128xf32>
    tpu.vector_store %arg6[%106, %c0_49, %c0_50], %109 {strides = array<i32>} : memref<8x16x128xf32, #tpu.memory_space<vmem>>, vector<1x16x128xf32>,
    %c5_i32 = arith.constant 5 : i32
    %110 = arith.index_cast %c5_i32 : i32 to index
    %c0_51 = arith.constant 0 : index
    %c0_52 = arith.constant 0 : index
    %111 = vector.load %arg2[%110, %c0_51, %c0_52] : memref<8x16x128xf32, #tpu.memory_space<vmem>>, vector<1x16x128xf32>
    %112 = vector.shape_cast %111 : vector<1x16x128xf32> to vector<16x128xf32>
    %113 = arith.addf %103, %112 : vector<16x128xf32>
    %114 = arith.truncf %113 : vector<16x128xf32> to vector<16x128xbf16>
    %cst_53 = arith.constant dense<0.000000e+00> : vector<16x128xf32>
    %115 = tpu.matmul %114, %4, %cst_53 {dimension_numbers = #tpu.dot_dimension_numbers<[1], [0], [0], [1], [0, 0, 1, 1], [], []>} : vector<16x128xbf16>, vector<128x128xbf16>, vector<16x128xf32> -> vector<16x128xf32>
    %116 = vector.broadcast %7 : vector<1x128xf32> to vector<16x128xf32>
    %117 = arith.addf %115, %116 : vector<16x128xf32>
    %cst_54 = arith.constant 0.000000e+00 : f32
    %118 = vector.broadcast %cst_54 : f32 to vector<16x128xf32>
    %119 = arith.maximumf %117, %118 : vector<16x128xf32>
    %120 = arith.truncf %119 : vector<16x128xf32> to vector<16x128xbf16>
    %cst_55 = arith.constant dense<0.000000e+00> : vector<16x128xf32>
    %121 = tpu.matmul %120, %6, %cst_55 {dimension_numbers = #tpu.dot_dimension_numbers<[1], [0], [0], [1], [0, 0, 1, 1], [], []>} : vector<16x128xbf16>, vector<128x128xbf16>, vector<16x128xf32> -> vector<16x128xf32>
    %122 = vector.broadcast %8 : vector<1x128xf32> to vector<16x128xf32>
    %123 = arith.addf %121, %122 : vector<16x128xf32>
    %cst_56 = arith.constant 0.000000e+00 : f32
    %124 = vector.broadcast %cst_56 : f32 to vector<16x128xf32>
    %125 = arith.maximumf %123, %124 : vector<16x128xf32>
    %126 = arith.index_cast %c5_i32 : i32 to index
    %c0_57 = arith.constant 0 : index
    %c0_58 = arith.constant 0 : index
    %127 = vector.load %arg6[%126, %c0_57, %c0_58] : memref<8x16x128xf32, #tpu.memory_space<vmem>>, vector<1x16x128xf32>
    %128 = vector.shape_cast %127 : vector<1x16x128xf32> to vector<16x128xf32>
    %129 = vector.shape_cast %125 : vector<16x128xf32> to vector<1x16x128xf32>
    tpu.vector_store %arg6[%126, %c0_57, %c0_58], %129 {strides = array<i32>} : memref<8x16x128xf32, #tpu.memory_space<vmem>>, vector<1x16x128xf32>,
    %c6_i32 = arith.constant 6 : i32
    %130 = arith.index_cast %c6_i32 : i32 to index
    %c0_59 = arith.constant 0 : index
    %c0_60 = arith.constant 0 : index
    %131 = vector.load %arg2[%130, %c0_59, %c0_60] : memref<8x16x128xf32, #tpu.memory_space<vmem>>, vector<1x16x128xf32>
    %132 = vector.shape_cast %131 : vector<1x16x128xf32> to vector<16x128xf32>
    %133 = arith.addf %123, %132 : vector<16x128xf32>
    %134 = arith.truncf %133 : vector<16x128xf32> to vector<16x128xbf16>
    %cst_61 = arith.constant dense<0.000000e+00> : vector<16x128xf32>
    %135 = tpu.matmul %134, %4, %cst_61 {dimension_numbers = #tpu.dot_dimension_numbers<[1], [0], [0], [1], [0, 0, 1, 1], [], []>} : vector<16x128xbf16>, vector<128x128xbf16>, vector<16x128xf32> -> vector<16x128xf32>
    %136 = vector.broadcast %7 : vector<1x128xf32> to vector<16x128xf32>
    %137 = arith.addf %135, %136 : vector<16x128xf32>
    %cst_62 = arith.constant 0.000000e+00 : f32
    %138 = vector.broadcast %cst_62 : f32 to vector<16x128xf32>
    %139 = arith.maximumf %137, %138 : vector<16x128xf32>
    %140 = arith.truncf %139 : vector<16x128xf32> to vector<16x128xbf16>
    %cst_63 = arith.constant dense<0.000000e+00> : vector<16x128xf32>
    %141 = tpu.matmul %140, %6, %cst_63 {dimension_numbers = #tpu.dot_dimension_numbers<[1], [0], [0], [1], [0, 0, 1, 1], [], []>} : vector<16x128xbf16>, vector<128x128xbf16>, vector<16x128xf32> -> vector<16x128xf32>
    %142 = vector.broadcast %8 : vector<1x128xf32> to vector<16x128xf32>
    %143 = arith.addf %141, %142 : vector<16x128xf32>
    %cst_64 = arith.constant 0.000000e+00 : f32
    %144 = vector.broadcast %cst_64 : f32 to vector<16x128xf32>
    %145 = arith.maximumf %143, %144 : vector<16x128xf32>
    %146 = arith.index_cast %c6_i32 : i32 to index
    %c0_65 = arith.constant 0 : index
    %c0_66 = arith.constant 0 : index
    %147 = vector.load %arg6[%146, %c0_65, %c0_66] : memref<8x16x128xf32, #tpu.memory_space<vmem>>, vector<1x16x128xf32>
    %148 = vector.shape_cast %147 : vector<1x16x128xf32> to vector<16x128xf32>
    %149 = vector.shape_cast %145 : vector<16x128xf32> to vector<1x16x128xf32>
    tpu.vector_store %arg6[%146, %c0_65, %c0_66], %149 {strides = array<i32>} : memref<8x16x128xf32, #tpu.memory_space<vmem>>, vector<1x16x128xf32>,
    %c7_i32 = arith.constant 7 : i32
    %150 = arith.index_cast %c7_i32 : i32 to index
    %c0_67 = arith.constant 0 : index
    %c0_68 = arith.constant 0 : index
    %151 = vector.load %arg2[%150, %c0_67, %c0_68] : memref<8x16x128xf32, #tpu.memory_space<vmem>>, vector<1x16x128xf32>
    %152 = vector.shape_cast %151 : vector<1x16x128xf32> to vector<16x128xf32>
    %153 = arith.addf %143, %152 : vector<16x128xf32>
    %154 = arith.truncf %153 : vector<16x128xf32> to vector<16x128xbf16>
    %cst_69 = arith.constant dense<0.000000e+00> : vector<16x128xf32>
    %155 = tpu.matmul %154, %4, %cst_69 {dimension_numbers = #tpu.dot_dimension_numbers<[1], [0], [0], [1], [0, 0, 1, 1], [], []>} : vector<16x128xbf16>, vector<128x128xbf16>, vector<16x128xf32> -> vector<16x128xf32>
    %156 = vector.broadcast %7 : vector<1x128xf32> to vector<16x128xf32>
    %157 = arith.addf %155, %156 : vector<16x128xf32>
    %cst_70 = arith.constant 0.000000e+00 : f32
    %158 = vector.broadcast %cst_70 : f32 to vector<16x128xf32>
    %159 = arith.maximumf %157, %158 : vector<16x128xf32>
    %160 = arith.truncf %159 : vector<16x128xf32> to vector<16x128xbf16>
    %cst_71 = arith.constant dense<0.000000e+00> : vector<16x128xf32>
    %161 = tpu.matmul %160, %6, %cst_71 {dimension_numbers = #tpu.dot_dimension_numbers<[1], [0], [0], [1], [0, 0, 1, 1], [], []>} : vector<16x128xbf16>, vector<128x128xbf16>, vector<16x128xf32> -> vector<16x128xf32>
    %162 = vector.broadcast %8 : vector<1x128xf32> to vector<16x128xf32>
    %163 = arith.addf %161, %162 : vector<16x128xf32>
    %cst_72 = arith.constant 0.000000e+00 : f32
    %164 = vector.broadcast %cst_72 : f32 to vector<16x128xf32>
    %165 = arith.maximumf %163, %164 : vector<16x128xf32>
    %166 = arith.index_cast %c7_i32 : i32 to index
    %c0_73 = arith.constant 0 : index
    %c0_74 = arith.constant 0 : index
    %167 = vector.load %arg6[%166, %c0_73, %c0_74] : memref<8x16x128xf32, #tpu.memory_space<vmem>>, vector<1x16x128xf32>
    %168 = vector.shape_cast %167 : vector<1x16x128xf32> to vector<16x128xf32>
    %169 = vector.shape_cast %165 : vector<16x128xf32> to vector<1x16x128xf32>
    tpu.vector_store %arg6[%166, %c0_73, %c0_74], %169 {strides = array<i32>} : memref<8x16x128xf32, #tpu.memory_space<vmem>>, vector<1x16x128xf32>,
    %c8_i32 = arith.constant 8 : i32
    %c0_75 = arith.constant 0 : index
    %c0_76 = arith.constant 0 : index
    %170 = vector.load %arg8[%c0_75, %c0_76] : memref<16x128xf32, #tpu.memory_space<vmem>>, vector<16x128xf32>
    tpu.vector_store %arg8[%c0_75, %c0_76], %163 {strides = array<i32>} : memref<16x128xf32, #tpu.memory_space<vmem>>, vector<16x128xf32>,
    %c0_i32_77 = arith.constant 0 : i32
    %171 = arith.cmpi eq, %arg1, %c0_i32_77 : i32
    %172 = arith.extui %171 : i1 to i32
    %c0_i32_78 = arith.constant 0 : i32
    %173 = arith.cmpi ne, %172, %c0_i32_78 : i32
    scf.if %173 {
      %c0_79 = arith.constant 0 : index
      %c0_80 = arith.constant 0 : index
      %174 = vector.load %arg7[%c0_79, %c0_80] : memref<16x128xf32, #tpu.memory_space<vmem>>, vector<16x128xf32>
      tpu.vector_store %arg7[%c0_79, %c0_80], %163 {strides = array<i32>} : memref<16x128xf32, #tpu.memory_space<vmem>>, vector<16x128xf32>,
    } else {
    }
    return
  }
  func.func @transform_0(%arg0: i32, %arg1: i32) -> (i32, i32, i32) {
    %c0_i32 = arith.constant 0 : i32
    %c0_i32_0 = arith.constant 0 : i32
    return %arg1, %arg0, %c0_i32 : i32, i32, i32
  }
  func.func @transform_1(%arg0: i32, %arg1: i32) -> (i32, i32) {
    %c0_i32 = arith.constant 0 : i32
    %c0_i32_0 = arith.constant 0 : i32
    return %arg0, %c0_i32 : i32, i32
  }
  func.func @transform_2(%arg0: i32, %arg1: i32) -> (i32, i32, i32) {
    %c0_i32 = arith.constant 0 : i32
    %c0_i32_0 = arith.constant 0 : i32
    %c0_i32_1 = arith.constant 0 : i32
    %c0_i32_2 = arith.constant 0 : i32
    return %c0_i32, %c0_i32_0, %c0_i32_1 : i32, i32, i32
  }
  func.func @transform_3(%arg0: i32, %arg1: i32) -> (i32, i32) {
    %c0_i32 = arith.constant 0 : i32
    %c0_i32_0 = arith.constant 0 : i32
    %c0_i32_1 = arith.constant 0 : i32
    return %c0_i32, %c0_i32_0 : i32, i32
  }
  func.func @transform_4(%arg0: i32, %arg1: i32) -> (i32, i32, i32) {
    %c0_i32 = arith.constant 0 : i32
    %c0_i32_0 = arith.constant 0 : i32
    return %arg1, %arg0, %c0_i32 : i32, i32, i32
  }
  func.func @transform_5(%arg0: i32, %arg1: i32) -> (i32, i32) {
    %c0_i32 = arith.constant 0 : i32
    %c0_i32_0 = arith.constant 0 : i32
    return %arg0, %c0_i32 : i32, i32
  }
}

</mosaic_0001>

<bundles_post_ra>
// kernel: tpu_custom_call.1
= control target key start
LH: loop header
LB: loop body
LE: loop exit
PB: predicated region body
PF: predicated region fallthrough
CT: control target
= control target key end

     0   :  { %11 = vsyncpa [#allocation4], 0  ;;  %s1077_s0 = inlined_call_operand.hbm [shape: f32[8,16,128], index: 0, kind: input, shape index: {}]   ;;  %s1078_s1 = inlined_call_operand.hbm [shape: f32[16,128], index: 1, kind: input, shape index: {}]   ;;  %s1079_s2 = inlined_call_operand.hbm [shape: bf16[2,128,128], index: 2, kind: input, shape index: {}]   ;;  %s1080_s3 = inlined_call_operand.vmem [shape: f32[2,128], index: 3, kind: input, shape index: {}]   ;;  %s1081_s4 = inlined_call_operand.hbm [shape: f32[8,16,128], index: 4, kind: output, shape index: {0}]   ;;  %s1082_s5 = inlined_call_operand.hbm [shape: f32[16,128], index: 5, kind: output, shape index: {1}]  }
   0x1   :  { %12 = vsyncpa [#allocation7], 0 }
   0x2   :  { %13 = vsyncpa [#allocation5], 0 }
   0x3   :  { %14 = vsyncpa [#allocation11], 0  ;;  %s32_s20 = sshll.u32 %s1078_s1, 4  ;;  %s809_s21 = smov [#allocation6]   ;;  %s33_s20 = int_to_ptr.hbm [resolvable:$true] %s32_s20 }
   0x4   :  { %s34_s22 = sshll.u32 %s809_s21, 4  ;;  %s19_s25 = sshll.u32 %s1077_s0, 4  ;;  %s35_s22 = int_to_ptr.vmem [resolvable:$true] %s34_s22  ;;  %s20_s25 = int_to_ptr.hbm [resolvable:$true] %s19_s25 }
   0x5   :  { %s810_s26 = smov 128   ;;  %s811_s27 = smov 8  }
   0x6   :  { %40 = dma.hbm_to_vmem [thread:$0]  %s33_s20, 256, %s35_s22, [#allocation7], %s810_s26, %s810_s26, %s811_s27  }
   0x7   :  { %s812_s28 = smov [#allocation3]   ;;  %s45_s1 = sshll.u32 %s1079_s2, 4  ;;  %s46_s1 = int_to_ptr.hbm [resolvable:$true] %s45_s1 }
   0x8   :  { %s21_s29 = sshll.u32 %s812_s28, 4  ;;  %s813_s0 = smov [#allocation8]   ;;  %s22_s29 = int_to_ptr.vmem [resolvable:$true] %s21_s29 }
   0x9   :  { %27 = dma.hbm_to_vmem [thread:$0]  %s20_s25, 2048, %s22_s29, [#allocation4], %s810_s26, %s810_s26, %s811_s27  }
   0xa   :  { %s47_s7 = sshll.u32 %s813_s0, 4  ;;  %s814_s8 = smov 64   ;;  %s48_s7 = int_to_ptr.vmem [resolvable:$true] %s47_s7 }
   0xb   :  { %s815_s9 = smov 4  }
   0xc   :  { %53 = dma.hbm_to_vmem [thread:$0]  %s46_s1, 2048, %s48_s7, [#allocation7], %s814_s8, %s814_s8, %s815_s9  }
   0xd   :  { %801 = dma.done.wait [#allocation4], 2048  }
   0xe   :  { %802 = vsyncadd [#allocation4], 4294965248 }
   0xf   :  { %803 = dma.done.wait [#allocation7], 2304  }
  0x10   :  { %804 = vsyncadd [#allocation7], 4294964992  ;;  %v863_v0 = vld [vmem:[#allocation8 + $0x38] sm:$0xff]  ;;  %v866_v1 = vld [vmem:[#allocation8 + $0x30] sm:$0xff]  ;;  %s571_s16 = sshll.u32 %s1082_s5, 4  ;;  %s817_s17 = smov [#allocation9]   ;;  %s572_s16 = int_to_ptr.hbm [resolvable:$true] %s571_s16 }
  0x11   :  { %167 = vmatpush.bf16.msra.mxu0 %v863_v0  ;;  %257 = vmatpush.bf16.msra.mxu2 %v863_v0  ;;  %v869_v2 = vld [vmem:[#allocation8 + $0x78] sm:$0xff]  ;;  %v872_v3 = vld [vmem:[#allocation8 + $0x28] sm:$0xff]  ;;  %v875_v4 = vld [vmem:[#allocation8 + $0x70] sm:$0xff]  ;;  %s556_s18 = sshll.u32 %s817_s17, 4  ;;  %s558_s21 = sshll.u32 %s1081_s4, 4  ;;  %s557_s18 = int_to_ptr.vmem [resolvable:$true] %s556_s18  ;;  %s559_s21 = int_to_ptr.hbm [resolvable:$true] %s558_s21 }
  0x12   :  { %233 = vmatpush.bf16.msra.mxu1 %v869_v2  ;;  %274 = vmatpush.bf16.msra.mxu3 %v869_v2  ;;  %v880_v5 = vld [vmem:[#allocation8 + $0x20] sm:$0xff]  ;;  %v883_v6 = vld [vmem:[#allocation8 + $0x68] sm:$0xff]  ;;  %v888_v7 = vld [vmem:[#allocation8 + $0x18] sm:$0xff] }
  0x13   :  { %v891_v8 = vld [vmem:[#allocation8 + $0x60] sm:$0xff]  ;;  %v896_v9 = vld [vmem:[#allocation8 + $0x10] sm:$0xff]  ;;  %v901_v10 = vld [vmem:[#allocation8 + $0x8] sm:$0xff] }
  0x14   :  { %v72_v11 = vld [vmem:[#allocation6] sm:$0xff]  ;;  %v73_v12 = vld [vmem:[#allocation6 + $0x8] sm:$0xff]  ;;  %v906_v17 = vld [vmem:[#allocation8] sm:$0xff] }
  0x15   :  { %168 = vmatpush.bf16.msra.mxu0 %v866_v1  ;;  %258 = vmatpush.bf16.msra.mxu2 %v866_v1  ;;  %v113_v13 = vld [vmem:[#allocation3] sm:$0xff]  ;;  %v114_v14 = vld [vmem:[#allocation3 + $0x8] sm:$0xff]  ;;  %v943_v21 = vld [vmem:[#allocation8 + $0x48] sm:$0xff] }
  0x16   :  { %234 = vmatpush.bf16.msra.mxu1 %v875_v4  ;;  %275 = vmatpush.bf16.msra.mxu3 %v875_v4  ;;  %v115_v15 = vadd.f32 %v113_v13, %v72_v11  ;;  %v116_v16 = vadd.f32 %v114_v14, %v73_v12  ;;  %v935_v19 = vld [vmem:[#allocation8 + $0x58] sm:$0xff]  ;;  %v939_v20 = vld [vmem:[#allocation8 + $0x50] sm:$0xff]  ;;  %v947_v22 = vld [vmem:[#allocation8 + $0x40] sm:$0xff] }
  0x17   :  { %v966_v24 = vld [vmem:[%s1080_s3] ss:$0 sm:$0xff]  ;;  %v985_v31 = vld [vmem:[%s1080_s3 + $0x1] ss:$0 sm:$0xff]  ;;  %v252_v35 = vld [vmem:[#allocation3 + $0x10] sm:$0xff]  ;;  %s816_s3 = smov [#allocation10]  }
  0x18   :  { %v117_v18 = vpack.c.bf16 %v116_v16, %v115_v15  ;;  %v253_v37 = vld [vmem:[#allocation3 + $0x18] sm:$0xff]  ;;  %v294_v53 = vld [vmem:[#allocation3 + $0x20] sm:$0xff]  ;;  %v295_v55 = vld [vmem:[#allocation3 + $0x28] sm:$0xff]  ;;  %s569_s13 = sshll.u32 %s816_s3, 4  ;;  %s570_s13 = int_to_ptr.vmem [resolvable:$true] %s569_s13 }
  0x19   :  { %169 = vmatpush.bf16.msra.mxu0 %v872_v3  ;;  %259 = vmatpush.bf16.msra.mxu2 %v872_v3 }
  0x1a   :  { %235 = vmatpush.bf16.msra.mxu1 %v883_v6  ;;  %276 = vmatpush.bf16.msra.mxu3 %v883_v6 }
  0x1d   :  { %170 = vmatpush.bf16.msra.mxu0 %v880_v5  ;;  %260 = vmatpush.bf16.msra.mxu2 %v880_v5 }
  0x1e   :  { %236 = vmatpush.bf16.msra.mxu1 %v891_v8  ;;  %277 = vmatpush.bf16.msra.mxu3 %v891_v8 }
  0x21   :  { %171 = vmatpush.bf16.msra.mxu0 %v888_v7  ;;  %261 = vmatpush.bf16.msra.mxu2 %v888_v7 }
  0x22   :  { %237 = vmatpush.bf16.msra.mxu1 %v935_v19  ;;  %278 = vmatpush.bf16.msra.mxu3 %v935_v19 }
  0x25   :  { %172 = vmatpush.bf16.msra.mxu0 %v896_v9  ;;  %262 = vmatpush.bf16.msra.mxu2 %v896_v9 }
  0x26   :  { %238 = vmatpush.bf16.msra.mxu1 %v939_v20  ;;  %279 = vmatpush.bf16.msra.mxu3 %v939_v20 }
  0x29   :  { %173 = vmatpush.bf16.msra.mxu0 %v901_v10  ;;  %263 = vmatpush.bf16.msra.mxu2 %v901_v10 }
  0x2a   :  { %239 = vmatpush.bf16.msra.mxu1 %v943_v21  ;;  %280 = vmatpush.bf16.msra.mxu3 %v943_v21 }
  0x2d   :  { %174 = vmatpush.bf16.msra.mxu0 %v906_v17  ;;  %264 = vmatpush.bf16.msra.mxu2 %v906_v17 }
  0x2e   :  { %240 = vmatpush.bf16.msra.mxu1 %v947_v22  ;;  %281 = vmatpush.bf16.msra.mxu3 %v947_v22 }
  0x30   :  { %175 = vmatmul.bf16.vlgmr.msra.gmra.mxu0 %v117_v18 }
  0x31   :  { %299 = vmatpush.bf16.msrb.mxu0 %v863_v0  ;;  %341 = vmatpush.bf16.msrb.mxu2 %v863_v0 }
  0x32   :  { %316 = vmatpush.bf16.msrb.mxu1 %v869_v2  ;;  %358 = vmatpush.bf16.msrb.mxu3 %v869_v2 }
  0x35   :  { %300 = vmatpush.bf16.msrb.mxu0 %v866_v1  ;;  %342 = vmatpush.bf16.msrb.mxu2 %v866_v1 }
  0x36   :  { %317 = vmatpush.bf16.msrb.mxu1 %v875_v4  ;;  %359 = vmatpush.bf16.msrb.mxu3 %v875_v4 }
  0x39   :  { %301 = vmatpush.bf16.msrb.mxu0 %v872_v3  ;;  %343 = vmatpush.bf16.msrb.mxu2 %v872_v3 }
  0x3a   :  { %318 = vmatpush.bf16.msrb.mxu1 %v883_v6  ;;  %360 = vmatpush.bf16.msrb.mxu3 %v883_v6 }
  0x3d   :  { %302 = vmatpush.bf16.msrb.mxu0 %v880_v5  ;;  %344 = vmatpush.bf16.msrb.mxu2 %v880_v5 }
  0x3e   :  { %319 = vmatpush.bf16.msrb.mxu1 %v891_v8  ;;  %361 = vmatpush.bf16.msrb.mxu3 %v891_v8 }
  0x41   :  { %303 = vmatpush.bf16.msrb.mxu0 %v888_v7  ;;  %345 = vmatpush.bf16.msrb.mxu2 %v888_v7 }
  0x42   :  { %320 = vmatpush.bf16.msrb.mxu1 %v935_v19  ;;  %362 = vmatpush.bf16.msrb.mxu3 %v935_v19 }
  0x45   :  { %304 = vmatpush.bf16.msrb.mxu0 %v896_v9  ;;  %346 = vmatpush.bf16.msrb.mxu2 %v896_v9 }
  0x46   :  { %321 = vmatpush.bf16.msrb.mxu1 %v939_v20  ;;  %363 = vmatpush.bf16.msrb.mxu3 %v939_v20 }
  0x49   :  { %305 = vmatpush.bf16.msrb.mxu0 %v901_v10  ;;  %347 = vmatpush.bf16.msrb.mxu2 %v901_v10 }
  0x4a   :  { %322 = vmatpush.bf16.msrb.mxu1 %v943_v21  ;;  %364 = vmatpush.bf16.msrb.mxu3 %v943_v21 }
  0x4d   :  { %306 = vmatpush.bf16.msrb.mxu0 %v906_v17  ;;  %348 = vmatpush.bf16.msrb.mxu2 %v906_v17 }
  0x4e   :  { %323 = vmatpush.bf16.msrb.mxu1 %v947_v22  ;;  %365 = vmatpush.bf16.msrb.mxu3 %v947_v22 }
  0x51   :  { %383 = vmatpush.bf16.msra.mxu0 %v863_v0 }
  0x55   :  { %384 = vmatpush.bf16.msra.mxu0 %v866_v1 }
  0x59   :  { %385 = vmatpush.bf16.msra.mxu0 %v872_v3 }
  0x5d   :  { %386 = vmatpush.bf16.msra.mxu0 %v880_v5 }
  0x61   :  { %387 = vmatpush.bf16.msra.mxu0 %v888_v7 }
  0x65   :  { %388 = vmatpush.bf16.msra.mxu0 %v896_v9 }
  0x69   :  { %389 = vmatpush.bf16.msra.mxu0 %v901_v10 }
  0x6d   :  { %390 = vmatpush.bf16.msra.mxu0 %v906_v17 }
  0xad   :  { %v176_v23 = vpop.f32.mrf.mxu0 }
  0xae   :  { %v177_v25 = vadd.f32 %v966_v24, %v176_v23  ;;  %v336_v23 = vld [vmem:[#allocation3 + $0x30] sm:$0xff] }
  0xb0   :  { %v181_v28 = vmax.f32 %v177_v25, 0.0 }
  0xb5   :  { %v178_v26 = vpop.f32.mrf.mxu0 }
  0xb6   :  { %v179_v27 = vadd.f32 %v966_v24, %v178_v26  ;;  %v337_v26 = vld [vmem:[#allocation3 + $0x38] sm:$0xff] }
  0xb8   :  { %v182_v29 = vmax.f32 %v179_v27, 0.0 }
  0xba   :  { %v183_v30 = vpack.c.bf16 %v182_v29, %v181_v28 }
  0xbc   :  { %241 = vmatmul.bf16.vlgmr.msra.gmra.mxu1 %v183_v30 }
  0xbd   :  { %400 = vmatpush.bf16.msra.mxu1 %v869_v2 }
  0xc1   :  { %401 = vmatpush.bf16.msra.mxu1 %v875_v4 }
  0xc5   :  { %402 = vmatpush.bf16.msra.mxu1 %v883_v6 }
  0xc9   :  { %403 = vmatpush.bf16.msra.mxu1 %v891_v8 }
  0xcd   :  { %404 = vmatpush.bf16.msra.mxu1 %v935_v19 }
  0xd1   :  { %405 = vmatpush.bf16.msra.mxu1 %v939_v20 }
  0xd5   :  { %406 = vmatpush.bf16.msra.mxu1 %v943_v21 }
  0xd9   :  { %407 = vmatpush.bf16.msra.mxu1 %v947_v22 }
 0x139   :  { %v242_v32 = vpop.f32.mrf.mxu1 }
 0x13a   :  { %v243_v33 = vadd.f32 %v985_v31, %v242_v32 }
 0x13c   :  { %v247_v34 = vmax.f32 %v243_v33, 0.0  ;;  %v254_v39 = vadd.f32 %v252_v35, %v243_v33 }
 0x13e   :  { %249 = vst [vmem:[#allocation9] sm:$0xff] %v247_v34 }
 0x141   :  { %v244_v36 = vpop.f32.mrf.mxu1 }
 0x142   :  { %v245_v38 = vadd.f32 %v985_v31, %v244_v36 }
 0x144   :  { %v248_v40 = vmax.f32 %v245_v38, 0.0  ;;  %v255_v41 = vadd.f32 %v253_v37, %v245_v38 }
 0x146   :  { %250 = vst [vmem:[#allocation9 + $0x8] sm:$0xff] %v248_v40  ;;  %v256_v42 = vpack.c.bf16 %v255_v41, %v254_v39 }
 0x148   :  { %265 = vmatmul.bf16.vlgmr.msra.gmra.mxu2 %v256_v42 }
 0x149   :  { %425 = vmatpush.bf16.msra.mxu2 %v863_v0 }
 0x14d   :  { %426 = vmatpush.bf16.msra.mxu2 %v866_v1 }
 0x151   :  { %427 = vmatpush.bf16.msra.mxu2 %v872_v3 }
 0x155   :  { %428 = vmatpush.bf16.msra.mxu2 %v880_v5 }
 0x159   :  { %429 = vmatpush.bf16.msra.mxu2 %v888_v7 }
 0x15d   :  { %430 = vmatpush.bf16.msra.mxu2 %v896_v9 }
 0x161   :  { %431 = vmatpush.bf16.msra.mxu2 %v901_v10 }
 0x165   :  { %432 = vmatpush.bf16.msra.mxu2 %v906_v17 }
 0x1cb   :  { %v266_v43 = vpop.f32.mrf.mxu2 }
 0x1cc   :  { %v267_v44 = vadd.f32 %v966_v24, %v266_v43 }
 0x1ce   :  { %v271_v47 = vmax.f32 %v267_v44, 0.0 }
 0x1d3   :  { %v268_v45 = vpop.f32.mrf.mxu2 }
 0x1d4   :  { %v269_v46 = vadd.f32 %v966_v24, %v268_v45  ;;  %v420_v45 = vld [vmem:[#allocation3 + $0x50] sm:$0xff] }
 0x1d6   :  { %v272_v48 = vmax.f32 %v269_v46, 0.0 }
 0x1d8   :  { %v273_v49 = vpack.c.bf16 %v272_v48, %v271_v47  ;;  %v421_v47 = vld [vmem:[#allocation3 + $0x58] sm:$0xff] }
 0x1da   :  { %282 = vmatmul.bf16.vlgmr.msra.gmra.mxu3 %v273_v49 }
 0x1db   :  { %442 = vmatpush.bf16.msra.mxu3 %v869_v2 }
 0x1df   :  { %443 = vmatpush.bf16.msra.mxu3 %v875_v4 }
 0x1e3   :  { %444 = vmatpush.bf16.msra.mxu3 %v883_v6 }
 0x1e7   :  { %445 = vmatpush.bf16.msra.mxu3 %v891_v8 }
 0x1eb   :  { %446 = vmatpush.bf16.msra.mxu3 %v935_v19 }
 0x1ef   :  { %447 = vmatpush.bf16.msra.mxu3 %v939_v20 }
 0x1f3   :  { %448 = vmatpush.bf16.msra.mxu3 %v943_v21 }
 0x1f7   :  { %449 = vmatpush.bf16.msra.mxu3 %v947_v22 }
 0x25d   :  { %v283_v50 = vpop.f32.mrf.mxu3 }
 0x25e   :  { %v284_v51 = vadd.f32 %v985_v31, %v283_v50 }
 0x260   :  { %v288_v52 = vmax.f32 %v284_v51, 0.0  ;;  %v296_v57 = vadd.f32 %v294_v53, %v284_v51 }
 0x262   :  { %291 = vst [vmem:[#allocation9 + $0x10] sm:$0xff] %v288_v52 }
 0x265   :  { %v285_v54 = vpop.f32.mrf.mxu3 }
 0x266   :  { %v286_v56 = vadd.f32 %v985_v31, %v285_v54 }
 0x268   :  { %v289_v58 = vmax.f32 %v286_v56, 0.0  ;;  %v297_v59 = vadd.f32 %v295_v55, %v286_v56 }
 0x26a   :  { %292 = vst [vmem:[#allocation9 + $0x18] sm:$0xff] %v289_v58  ;;  %v298_v60 = vpack.c.bf16 %v297_v59, %v296_v57 }
 0x26c   :  { %307 = vmatmul.bf16.vlgmr.msrb.gmra.mxu0 %v298_v60 }
 0x26d   :  { %467 = vmatpush.bf16.msrb.mxu0 %v863_v0 }
 0x271   :  { %468 = vmatpush.bf16.msrb.mxu0 %v866_v1 }
 0x275   :  { %469 = vmatpush.bf16.msrb.mxu0 %v872_v3 }
 0x279   :  { %470 = vmatpush.bf16.msrb.mxu0 %v880_v5 }
 0x27d   :  { %471 = vmatpush.bf16.msrb.mxu0 %v888_v7 }
 0x281   :  { %472 = vmatpush.bf16.msrb.mxu0 %v896_v9 }
 0x285   :  { %473 = vmatpush.bf16.msrb.mxu0 %v901_v10 }
 0x289   :  { %474 = vmatpush.bf16.msrb.mxu0 %v906_v17 }
 0x2e9   :  { %v308_v61 = vpop.f32.mrf.mxu0 }
 0x2ea   :  { %v309_v62 = vadd.f32 %v966_v24, %v308_v61 }
 0x2ec   :  { %v313_v12 = vmax.f32 %v309_v62, 0.0 }
 0x2f1   :  { %v310_v63 = vpop.f32.mrf.mxu0 }
 0x2f2   :  { %v311_v11 = vadd.f32 %v966_v24, %v310_v63  ;;  %v462_v63 = vld [vmem:[#allocation3 + $0x60] sm:$0xff] }
 0x2f4   :  { %v314_v13 = vmax.f32 %v311_v11, 0.0 }
 0x2f6   :  { %v315_v14 = vpack.c.bf16 %v314_v13, %v313_v12  ;;  %v463_v12 = vld [vmem:[#allocation3 + $0x68] sm:$0xff] }
 0x2f8   :  { %324 = vmatmul.bf16.vlgmr.msrb.gmra.mxu1 %v315_v14 }
 0x2f9   :  { %484 = vmatpush.bf16.msrb.mxu1 %v869_v2 }
 0x2fd   :  { %485 = vmatpush.bf16.msrb.mxu1 %v875_v4 }
 0x301   :  { %486 = vmatpush.bf16.msrb.mxu1 %v883_v6 }
 0x305   :  { %487 = vmatpush.bf16.msrb.mxu1 %v891_v8 }
 0x309   :  { %488 = vmatpush.bf16.msrb.mxu1 %v935_v19 }
 0x30d   :  { %489 = vmatpush.bf16.msrb.mxu1 %v939_v20 }
 0x311   :  { %490 = vmatpush.bf16.msrb.mxu1 %v943_v21 }
 0x315   :  { %491 = vmatpush.bf16.msrb.mxu1 %v947_v22 }
 0x375   :  { %v325_v15 = vpop.f32.mrf.mxu1 }
 0x376   :  { %v326_v16 = vadd.f32 %v985_v31, %v325_v15 }
 0x378   :  { %v330_v18 = vmax.f32 %v326_v16, 0.0  ;;  %v338_v28 = vadd.f32 %v336_v23, %v326_v16 }
 0x37a   :  { %333 = vst [vmem:[#allocation9 + $0x20] sm:$0xff] %v330_v18 }
 0x37d   :  { %v327_v25 = vpop.f32.mrf.mxu1 }
 0x37e   :  { %v328_v27 = vadd.f32 %v985_v31, %v327_v25 }
 0x380   :  { %v331_v29 = vmax.f32 %v328_v27, 0.0  ;;  %v339_v30 = vadd.f32 %v337_v26, %v328_v27 }
 0x382   :  { %334 = vst [vmem:[#allocation9 + $0x28] sm:$0xff] %v331_v29  ;;  %v340_v32 = vpack.c.bf16 %v339_v30, %v338_v28 }
 0x384   :  { %349 = vmatmul.bf16.vlgmr.msrb.gmra.mxu2 %v340_v32 }
 0x385   :  { %509 = vmatpush.bf16.msrb.mxu2 %v863_v0 }
 0x389   :  { %510 = vmatpush.bf16.msrb.mxu2 %v866_v1 }
 0x38d   :  { %511 = vmatpush.bf16.msrb.mxu2 %v872_v3 }
 0x391   :  { %512 = vmatpush.bf16.msrb.mxu2 %v880_v5 }
 0x395   :  { %513 = vmatpush.bf16.msrb.mxu2 %v888_v7 }
 0x399   :  { %514 = vmatpush.bf16.msrb.mxu2 %v896_v9 }
 0x39d   :  { %515 = vmatpush.bf16.msrb.mxu2 %v901_v10 }
 0x3a1   :  { %516 = vmatpush.bf16.msrb.mxu2 %v906_v17 }
 0x407   :  { %v350_v33 = vpop.f32.mrf.mxu2 }
 0x408   :  { %v351_v34 = vadd.f32 %v966_v24, %v350_v33 }
 0x40a   :  { %v355_v36 = vmax.f32 %v351_v34, 0.0 }
 0x40f   :  { %v352_v35 = vpop.f32.mrf.mxu2 }
 0x410   :  { %v353_v0 = vadd.f32 %v966_v24, %v352_v35  ;;  %v504_v35 = vld [vmem:[#allocation3 + $0x70] sm:$0xff] }
 0x412   :  { %v356_v1 = vmax.f32 %v353_v0, 0.0 }
 0x414   :  { %v357_v37 = vpack.c.bf16 %v356_v1, %v355_v36  ;;  %v505_v36 = vld [vmem:[#allocation3 + $0x78] sm:$0xff] }
 0x416   :  { %366 = vmatmul.bf16.vlgmr.msrb.gmra.mxu3 %v357_v37 }
 0x417   :  { %526 = vmatpush.bf16.msrb.mxu3 %v869_v2  ;;  %v378_v2 = vld [vmem:[#allocation3 + $0x40] sm:$0xff] }
 0x41b   :  { %527 = vmatpush.bf16.msrb.mxu3 %v875_v4  ;;  %v379_v4 = vld [vmem:[#allocation3 + $0x48] sm:$0xff] }
 0x41f   :  { %528 = vmatpush.bf16.msrb.mxu3 %v883_v6 }
 0x423   :  { %529 = vmatpush.bf16.msrb.mxu3 %v891_v8 }
 0x427   :  { %530 = vmatpush.bf16.msrb.mxu3 %v935_v19 }
 0x42b   :  { %531 = vmatpush.bf16.msrb.mxu3 %v939_v20 }
 0x42f   :  { %532 = vmatpush.bf16.msrb.mxu3 %v943_v21 }
 0x433   :  { %533 = vmatpush.bf16.msrb.mxu3 %v947_v22 }
 0x499   :  { %v367_v3 = vpop.f32.mrf.mxu3 }
 0x49a   :  { %v368_v5 = vadd.f32 %v985_v31, %v367_v3 }
 0x49c   :  { %v372_v7 = vmax.f32 %v368_v5, 0.0  ;;  %v380_v10 = vadd.f32 %v378_v2, %v368_v5 }
 0x49e   :  { %375 = vst [vmem:[#allocation9 + $0x30] sm:$0xff] %v372_v7 }
 0x4a1   :  { %v369_v9 = vpop.f32.mrf.mxu3 }
 0x4a2   :  { %v370_v6 = vadd.f32 %v985_v31, %v369_v9 }
 0x4a4   :  { %v373_v8 = vmax.f32 %v370_v6, 0.0  ;;  %v381_v17 = vadd.f32 %v379_v4, %v370_v6 }
 0x4a6   :  { %376 = vst [vmem:[#allocation9 + $0x38] sm:$0xff] %v373_v8  ;;  %v382_v19 = vpack.c.bf16 %v381_v17, %v380_v10 }
 0x4a8   :  { %391 = vmatmul.bf16.vlgmr.msra.gmra.mxu0 %v382_v19 }
 0x525   :  { %v392_v20 = vpop.f32.mrf.mxu0 }
 0x526   :  { %v393_v21 = vadd.f32 %v966_v24, %v392_v20 }
 0x528   :  { %v397_v39 = vmax.f32 %v393_v21, 0.0 }
 0x52d   :  { %v394_v22 = vpop.f32.mrf.mxu0 }
 0x52e   :  { %v395_v38 = vadd.f32 %v966_v24, %v394_v22 }
 0x530   :  { %v398_v40 = vmax.f32 %v395_v38, 0.0 }
 0x532   :  { %v399_v41 = vpack.c.bf16 %v398_v40, %v397_v39 }
 0x534   :  { %408 = vmatmul.bf16.vlgmr.msra.gmra.mxu1 %v399_v41 }
 0x5b1   :  { %v409_v42 = vpop.f32.mrf.mxu1 }
 0x5b2   :  { %v410_v43 = vadd.f32 %v985_v31, %v409_v42 }
 0x5b4   :  { %v414_v44 = vmax.f32 %v410_v43, 0.0  ;;  %v422_v49 = vadd.f32 %v420_v45, %v410_v43 }
 0x5b6   :  { %417 = vst [vmem:[#allocation9 + $0x40] sm:$0xff] %v414_v44 }
 0x5b9   :  { %v411_v46 = vpop.f32.mrf.mxu1 }
 0x5ba   :  { %v412_v48 = vadd.f32 %v985_v31, %v411_v46 }
 0x5bc   :  { %v415_v50 = vmax.f32 %v412_v48, 0.0  ;;  %v423_v51 = vadd.f32 %v421_v47, %v412_v48 }
 0x5be   :  { %418 = vst [vmem:[#allocation9 + $0x48] sm:$0xff] %v415_v50  ;;  %v424_v52 = vpack.c.bf16 %v423_v51, %v422_v49 }
 0x5c0   :  { %433 = vmatmul.bf16.vlgmr.msra.gmra.mxu2 %v424_v52 }
 0x643   :  { %v434_v53 = vpop.f32.mrf.mxu2 }
 0x644   :  { %v435_v54 = vadd.f32 %v966_v24, %v434_v53 }
 0x646   :  { %v439_v57 = vmax.f32 %v435_v54, 0.0 }
 0x64b   :  { %v436_v55 = vpop.f32.mrf.mxu2 }
 0x64c   :  { %v437_v56 = vadd.f32 %v966_v24, %v436_v55 }
 0x64e   :  { %v440_v58 = vmax.f32 %v437_v56, 0.0 }
 0x650   :  { %v441_v59 = vpack.c.bf16 %v440_v58, %v439_v57 }
 0x652   :  { %450 = vmatmul.bf16.vlgmr.msra.gmra.mxu3 %v441_v59 }
 0x6d5   :  { %v451_v60 = vpop.f32.mrf.mxu3 }
 0x6d6   :  { %v452_v61 = vadd.f32 %v985_v31, %v451_v60 }
 0x6d8   :  { %v456_v62 = vmax.f32 %v452_v61, 0.0  ;;  %v464_v14 = vadd.f32 %v462_v63, %v452_v61 }
 0x6da   :  { %459 = vst [vmem:[#allocation9 + $0x50] sm:$0xff] %v456_v62 }
 0x6dd   :  { %v453_v11 = vpop.f32.mrf.mxu3 }
 0x6de   :  { %v454_v13 = vadd.f32 %v985_v31, %v453_v11 }
 0x6e0   :  { %v457_v15 = vmax.f32 %v454_v13, 0.0  ;;  %v465_v16 = vadd.f32 %v463_v12, %v454_v13 }
 0x6e2   :  { %460 = vst [vmem:[#allocation9 + $0x58] sm:$0xff] %v457_v15  ;;  %v466_v18 = vpack.c.bf16 %v465_v16, %v464_v14 }
 0x6e4   :  { %475 = vmatmul.bf16.vlgmr.msrb.gmra.mxu0 %v466_v18 }
 0x761   :  { %v476_v23 = vpop.f32.mrf.mxu0 }
 0x762   :  { %v477_v25 = vadd.f32 %v966_v24, %v476_v23 }
 0x764   :  { %v481_v28 = vmax.f32 %v477_v25, 0.0 }
 0x769   :  { %v478_v26 = vpop.f32.mrf.mxu0 }
 0x76a   :  { %v479_v27 = vadd.f32 %v966_v24, %v478_v26 }
 0x76c   :  { %v482_v29 = vmax.f32 %v479_v27, 0.0 }
 0x76e   :  { %v483_v30 = vpack.c.bf16 %v482_v29, %v481_v28 }
 0x770   :  { %492 = vmatmul.bf16.vlgmr.msrb.gmra.mxu1 %v483_v30 }
 0x7ed   :  { %v493_v32 = vpop.f32.mrf.mxu1 }
 0x7ee   :  { %v494_v33 = vadd.f32 %v985_v31, %v493_v32 }
 0x7f0   :  { %v498_v34 = vmax.f32 %v494_v33, 0.0  ;;  %v506_v37 = vadd.f32 %v504_v35, %v494_v33 }
 0x7f2   :  { %501 = vst [vmem:[#allocation9 + $0x60] sm:$0xff] %v498_v34 }
 0x7f5   :  { %v495_v0 = vpop.f32.mrf.mxu1 }
 0x7f6   :  { %v496_v1 = vadd.f32 %v985_v31, %v495_v0 }
 0x7f8   :  { %v499_v3 = vmax.f32 %v496_v1, 0.0  ;;  %v507_v5 = vadd.f32 %v505_v36, %v496_v1 }
 0x7fa   :  { %502 = vst [vmem:[#allocation9 + $0x68] sm:$0xff] %v499_v3  ;;  %v508_v7 = vpack.c.bf16 %v507_v5, %v506_v37 }
 0x7fc   :  { %517 = vmatmul.bf16.vlgmr.msrb.gmra.mxu2 %v508_v7 }
 0x87f   :  { %v518_v2 = vpop.f32.mrf.mxu2 }
 0x880   :  { %v519_v9 = vadd.f32 %v966_v24, %v518_v2 }
 0x882   :  { %v523_v10 = vmax.f32 %v519_v9, 0.0 }
 0x887   :  { %v520_v4 = vpop.f32.mrf.mxu2 }
 0x888   :  { %v521_v6 = vadd.f32 %v966_v24, %v520_v4 }
 0x88a   :  { %v524_v8 = vmax.f32 %v521_v6, 0.0 }
 0x88c   :  { %v525_v17 = vpack.c.bf16 %v524_v8, %v523_v10 }
 0x88e   :  { %534 = vmatmul.bf16.vlgmr.msrb.gmra.mxu3 %v525_v17 }
 0x911   :  { %v535_v19 = vpop.f32.mrf.mxu3 }
 0x912   :  { %v536_v20 = vadd.f32 %v985_v31, %v535_v19 }
 0x914   :  { %v540_v21 = vmax.f32 %v536_v20, 0.0  ;;  %550 = vst [vmem:[#allocation10] sm:$0xff] %v536_v20 }
 0x916   :  { %543 = vst [vmem:[#allocation9 + $0x70] sm:$0xff] %v540_v21 }
 0x919   :  { %v537_v22 = vpop.f32.mrf.mxu3 }
 0x91a   :  { %v538_v24 = vadd.f32 %v985_v31, %v537_v22 }
 0x91c   :  { %v541_v38 = vmax.f32 %v538_v24, 0.0  ;;  %551 = vst [vmem:[#allocation10 + $0x8] sm:$0xff] %v538_v24 }
 0x91d   :  { %577 = dma.vmem_to_hbm [thread:$0]  %s570_s13, 256, %s572_s16, [#allocation11], %s810_s26, %s810_s26, %s811_s27  }
 0x91e   :  { %544 = vst [vmem:[#allocation9 + $0x78] sm:$0xff] %v541_v38 }
 0x91f   :  { %564 = dma.vmem_to_hbm [thread:$0]  %s557_s18, 2048, %s559_s21, [#allocation5], %s810_s26, %s810_s26, %s811_s27  }
 0x920   :  { %805 = dma.done.wait [#allocation5], 2048  }
 0x921   :  { %806 = vsyncadd [#allocation5], 4294965248 }
 0x922   :  { %807 = dma.done.wait [#allocation11], 256  }
 0x923   :  { %808 = vsyncadd [#allocation11], 4294967040 }
 0x924   :  { %586 = vsyncpa [#allocation4], 1 }
 0x925   :  { %587 = vsyncpa [#allocation7], 1 }
 0x926   :  { %588 = vsyncpa [#allocation5], 1 }
 0x927   :  { %589 = vsyncpa [#allocation11], 1 }

</bundles_post_ra>
